<compile_context>
chip_gen: v5e
topology: v5e:2x2
jax: 0.10.0
libtpu: 0.0.40
codegen_flags: <defaults>
</compile_context>

<pallas_src>
import functools

import jax
import jax.numpy as jnp
from jax.experimental import pallas as pl
from jax.experimental.pallas import tpu as pltpu


def _regress_loss_tile_kernel(out_ref, tgt_ref, psum_ref, *, n_valid_rows,
                              tile_rows):
    """One batch tile: writes the tile's summed loss broadcast over (1,8,128)."""
    o = out_ref[...].astype(jnp.float32)   # (TB, C)
    t = tgt_ref[...].astype(jnp.float32)   # (TB, C)

    # log-softmax of outputs, numerically stable, no explicit softmax or log(0).
    o_max = jnp.max(o, axis=1, keepdims=True)            # (TB, 1)
    o_sh = o - o_max                                      # (TB, C)
    o_sum = jnp.sum(jnp.exp(o_sh), axis=1, keepdims=True)  # (TB, 1)
    lse_o = jnp.log(o_sum)                                # (TB, 1)

    # softmax(targets) folded into the row reduction:
    #   row_loss = sum_j -softmax(t)_j * log_softmax(o)_j
    #            = lse_o - (1 / sum_j exp(t_j - t_max)) * sum_j exp(t_j - t_max) * (o_j - o_max)
    t_max = jnp.max(t, axis=1, keepdims=True)             # (TB, 1)
    t_exp = jnp.exp(t - t_max)                            # (TB, C)
    t_sum = jnp.sum(t_exp, axis=1, keepdims=True)         # (TB, 1)
    weighted = jnp.sum(t_exp * o_sh, axis=1, keepdims=True)  # (TB, 1)
    row_loss = lse_o - weighted * pl.reciprocal(t_sum, approx=False)  # (TB, 1)

    # Mask rows added by padding the batch up to a multiple of the tile size.
    row_ids = (pl.program_id(0) * tile_rows
               + jax.lax.broadcasted_iota(jnp.int32, row_loss.shape, 0))
    row_loss = jnp.where(row_ids < n_valid_rows, row_loss, 0.0)

    # Lane-dense partial-sum block for this tile (single unmasked vreg store).
    psum_ref[...] = jnp.broadcast_to(jnp.sum(row_loss), psum_ref.shape)


def regress_loss(outputs, targets, *, max_tile_rows=1024,
                 vmem_input_budget_bytes=12 * 1024 * 1024):
    """Pallas implementation of regressLoss.forward(outputs, targets)."""
    assert outputs.shape == targets.shape and outputs.ndim == 2
    B, C = outputs.shape
    itemsize = jnp.dtype(outputs.dtype).itemsize

    # --- choose the batch tile size ------------------------------------------
    # 2 inputs x 2 pipeline buffers x (TB*C*itemsize) must stay inside a budget
    # that is safe on every generation (v5e 16 MiB scoped default, v7x 32 MiB
    # scoped / 64 MiB physical). Cap at max_tile_rows; floor at 8 sublanes.
    per_row_bytes = 2 * 2 * C * itemsize
    tb = max(8, min(max_tile_rows, vmem_input_budget_bytes // per_row_bytes))
    tb = max(8, (tb // 8) * 8)                  # multiple of 8 (sublane tiling)
    tb = min(tb, ((B + 7) // 8) * 8)            # no bigger than (padded) batch

    num_tiles = pl.cdiv(B, tb)
    b_pad = num_tiles * tb
    if b_pad != B:
        pad = b_pad - B
        outputs = jnp.pad(outputs, ((0, pad), (0, 0)))
        targets = jnp.pad(targets, ((0, pad), (0, 0)))

    kernel = functools.partial(_regress_loss_tile_kernel,
                               n_valid_rows=B, tile_rows=tb)

    partials = pl.pallas_call(
        kernel,
        out_shape=jax.ShapeDtypeStruct((num_tiles, 8, 128), jnp.float32),
        grid=(num_tiles,),
        in_specs=[
            pl.BlockSpec((tb, C), lambda i: (i, 0)),
            pl.BlockSpec((tb, C), lambda i: (i, 0)),
        ],
        out_specs=pl.BlockSpec((1, 8, 128), lambda i: (i, 0, 0)),
        compiler_params=pltpu.CompilerParams(
            dimension_semantics=("parallel",),
            vmem_limit_bytes=32 * 1024 * 1024,
        ),
        cost_estimate=pl.CostEstimate(
            flops=6 * b_pad * C,
            transcendentals=2 * b_pad * C + 2 * b_pad,
            bytes_accessed=2 * b_pad * C * itemsize + num_tiles * 8 * 128 * 4,
        ),
    )(outputs, targets)

    # Tiny final reduction + mean over ALL elements (padded rows contributed 0).
    return jnp.sum(partials[:, 0, 0]) / jnp.float32(B * C)


if __name__ == "__main__":
    key = jax.random.PRNGKey(0)
    k1, k2 = jax.random.split(key)

    # Lane-dense case; small tile forces a multi-tile grid (3 tiles of 8 rows).
    B, C = 24, 128
    outputs = jax.random.normal(k1, (B, C), dtype=jnp.float32)
    targets = jax.random.normal(k2, (B, C), dtype=jnp.float32)
    loss = regress_loss(outputs, targets, max_tile_rows=8)
    jax.block_until_ready(loss)

    t_sm = jax.nn.softmax(targets, axis=1)
    o_sm = jax.nn.softmax(outputs, axis=1)
    ref = jnp.mean(-t_sm * jnp.log(o_sm))
    assert jnp.allclose(loss, ref, rtol=1e-5, atol=1e-5), (loss, ref)

    # Ragged batch (exercises the padding + row-mask path), small class count.
    B2, C2 = 13, 32
    o2 = jax.random.normal(jax.random.PRNGKey(1), (B2, C2), dtype=jnp.float32)
    t2 = jax.random.normal(jax.random.PRNGKey(2), (B2, C2), dtype=jnp.float32)
    loss2 = regress_loss(o2, t2)
    jax.block_until_ready(loss2)
    ref2 = jnp.mean(-jax.nn.softmax(t2, axis=1) * jnp.log(jax.nn.softmax(o2, axis=1)))
    assert jnp.allclose(loss2, ref2, rtol=1e-5, atol=1e-5), (loss2, ref2)

    print("KERNEL_OK")
</pallas_src>

<mosaic_0001>
module attributes {stable_mosaic.version = 11 : i64} {
  func.func @_regress_loss_tile_kernel(%arg0: i32, %arg1: memref<8x128xf32, #tpu.memory_space<vmem>>, %arg2: memref<8x128xf32, #tpu.memory_space<vmem>>, %arg3: memref<1x8x128xf32, #tpu.memory_space<vmem>>) attributes {dimension_semantics = [#tpu.dimension_semantics<parallel>], iteration_bounds = array<i64: 3>, scalar_prefetch = 0 : i64, scratch_operands = 0 : i64, tpu.core_type = #tpu.core_type<tc>, window_params = [{transform_indices = @transform_0, window_bounds = array<i64: 8, 128>}, {transform_indices = @transform_1, window_bounds = array<i64: 8, 128>}, {transform_indices = @transform_2, window_bounds = array<i64: 1, 8, 128>}]} {
    %c0 = arith.constant 0 : index
    %c0_0 = arith.constant 0 : index
    %0 = vector.load %arg1[%c0, %c0_0] : memref<8x128xf32, #tpu.memory_space<vmem>>, vector<8x128xf32>
    %c0_1 = arith.constant 0 : index
    %c0_2 = arith.constant 0 : index
    %1 = vector.load %arg2[%c0_1, %c0_2] : memref<8x128xf32, #tpu.memory_space<vmem>>, vector<8x128xf32>
    %cst = arith.constant dense<0xFF800000> : vector<8xf32>
    %2 = vector.multi_reduction <maximumf>, %0, %cst [1] : vector<8x128xf32> to vector<8xf32>
    %3 = vector.shape_cast %2 : vector<8xf32> to vector<8x1xf32>
    %4 = vector.broadcast %3 : vector<8x1xf32> to vector<8x128xf32>
    %5 = arith.subf %0, %4 : vector<8x128xf32>
    %6 = math.exp %5 : vector<8x128xf32>
    %cst_3 = arith.constant dense<0.000000e+00> : vector<8xf32>
    %7 = vector.multi_reduction <add>, %6, %cst_3 [1] : vector<8x128xf32> to vector<8xf32>
    %8 = vector.shape_cast %7 : vector<8xf32> to vector<8x1xf32>
    %9 = math.log %8 : vector<8x1xf32>
    %cst_4 = arith.constant dense<0xFF800000> : vector<8xf32>
    %10 = vector.multi_reduction <maximumf>, %1, %cst_4 [1] : vector<8x128xf32> to vector<8xf32>
    %11 = vector.shape_cast %10 : vector<8xf32> to vector<8x1xf32>
    %12 = vector.broadcast %11 : vector<8x1xf32> to vector<8x128xf32>
    %13 = arith.subf %1, %12 : vector<8x128xf32>
    %14 = math.exp %13 : vector<8x128xf32>
    %cst_5 = arith.constant dense<0.000000e+00> : vector<8xf32>
    %15 = vector.multi_reduction <add>, %14, %cst_5 [1] : vector<8x128xf32> to vector<8xf32>
    %16 = vector.shape_cast %15 : vector<8xf32> to vector<8x1xf32>
    %17 = arith.mulf %14, %5 : vector<8x128xf32>
    %cst_6 = arith.constant dense<0.000000e+00> : vector<8xf32>
    %18 = vector.multi_reduction <add>, %17, %cst_6 [1] : vector<8x128xf32> to vector<8xf32>
    %19 = vector.shape_cast %18 : vector<8xf32> to vector<8x1xf32>
    %20 = tpu.reciprocal %16 : vector<8x1xf32> -> vector<8x1xf32>
    %21 = arith.mulf %19, %20 : vector<8x1xf32>
    %22 = arith.subf %9, %21 : vector<8x1xf32>
    %c8_i32 = arith.constant 8 : i32
    %23 = arith.muli %arg0, %c8_i32 : i32
    %24 = tpu.iota {dimensions = array<i32: 0>} : vector<8x1xi32>
    %25 = vector.broadcast %23 : i32 to vector<8x1xi32>
    %26 = arith.addi %25, %24 : vector<8x1xi32>
    %c24_i32 = arith.constant 24 : i32
    %27 = vector.broadcast %c24_i32 : i32 to vector<8x1xi32>
    %28 = arith.cmpi slt, %26, %27 : vector<8x1xi32>
    %cst_7 = arith.constant 0.000000e+00 : f32
    %29 = vector.broadcast %cst_7 : f32 to vector<8x1xf32>
    %30 = arith.select %28, %22, %29 : vector<8x1xi1>, vector<8x1xf32>
    %31 = vector.shape_cast %30 : vector<8x1xf32> to vector<1x8x1xf32>
    %cst_8 = arith.constant dense<0.000000e+00> : vector<1xf32>
    %32 = vector.multi_reduction <add>, %31, %cst_8 [1, 2] : vector<1x8x1xf32> to vector<1xf32>
    %33 = vector.shape_cast %32 : vector<1xf32> to vector<1x1x1xf32>
    %34 = vector.extract %33[0, 0, 0] : f32 from vector<1x1x1xf32>
    %35 = vector.broadcast %34 : f32 to vector<1x8x128xf32>
    %c0_9 = arith.constant 0 : index
    %c0_10 = arith.constant 0 : index
    %c0_11 = arith.constant 0 : index
    %36 = vector.load %arg3[%c0_9, %c0_10, %c0_11] : memref<1x8x128xf32, #tpu.memory_space<vmem>>, vector<1x8x128xf32>
    tpu.vector_store %arg3[%c0_9, %c0_10, %c0_11], %35 {strides = array<i32>} : memref<1x8x128xf32, #tpu.memory_space<vmem>>, vector<1x8x128xf32>,
    return
  }
  func.func @transform_0(%arg0: i32) -> (i32, i32) {
    %c0_i32 = arith.constant 0 : i32
    %c0_i32_0 = arith.constant 0 : i32
    return %arg0, %c0_i32 : i32, i32
  }
  func.func @transform_1(%arg0: i32) -> (i32, i32) {
    %c0_i32 = arith.constant 0 : i32
    %c0_i32_0 = arith.constant 0 : i32
    return %arg0, %c0_i32 : i32, i32
  }
  func.func @transform_2(%arg0: i32) -> (i32, i32, i32) {
    %c0_i32 = arith.constant 0 : i32
    %c0_i32_0 = arith.constant 0 : i32
    %c0_i32_1 = arith.constant 0 : i32
    return %arg0, %c0_i32, %c0_i32_0 : i32, i32, i32
  }
}

</mosaic_0001>

<bundles_post_ra>
// kernel: tpu_custom_call.1
= control target key start
LH: loop header
LB: loop body
LE: loop exit
PB: predicated region body
PF: predicated region fallthrough
CT: control target
= control target key end

     0   :  { %7 = vsyncpa [#allocation3], 0  ;;  %s757_s0 = inlined_call_operand.hbm [shape: f32[24,128], index: 0, kind: input, shape index: {}]   ;;  %s758_s1 = inlined_call_operand.hbm [shape: f32[24,128], index: 1, kind: input, shape index: {}]   ;;  %s759_s2 = inlined_call_operand.hbm [shape: f32[3,8,128], index: 2, kind: output, shape index: {}]  }
   0x1   :  { %9 = vsyncpa [#allocation3 + $0x1], 0 }
   0x2   :  { %10 = vsyncpa [#allocation6], 0 }
   0x3   :  { %12 = vsyncpa [#allocation6 + $0x1], 0 }
   0x4   :  { %13 = vsyncpa [#allocation4], 0 }
   0x5   :  { %15 = vsyncpa [#allocation4 + $0x1], 0  ;;  %s590_s9 = smov 0   ;;  %s592_s10 = smov 0  }
   0x6   :  { %s594_s11 = smov 0   ;;  %s596_s12 = smov 0  }
   0x7 LB: > { %s611_s13 = sadd.s32 4294967295, %s573_s12   ;;  %s366_s14 = sadd.s32 4294967294, %s573_s12   ;;  %s573_s12 = sphi %s596_s12, %s769_s12   ;;  %s569_s11 = sphi %s594_s11, %s768_s11   ;;  %s565_s10 = sphi %s592_s10, %s767_s10   ;;  %s561_s9 = sphi %s590_s9, %s766_s9  }
   0x8   : > { %s615_s15 = sadd.s32 1, %s573_s12   ;;  %s28_s16 = sadd.s32 1, %s569_s11 }
   0x9   : > { %s25_s17 = ssub.s32 %s573_s12, %s615_s15  ;;  %p35_p0 = scmp.ne.s32.totalorder %s569_s11, %s565_s10 }
   0xa   : > { %p26_p1 = scmp.eq.s32.totalorder %s25_s17, 0  ;;  %p36_p2 = scmp.eq.s32.totalorder %s573_s12, 0 }
   0xb   : > { %p41_p3 = scmp.ne.s32.totalorder %s565_s10, %s561_s9  ;;  %p42_p4 = scmp.eq.s32.totalorder %s611_s13, 0 }
   0xc   : > { %s627_s18 = scalar_select %p26_p1, %s569_s11, %s28_s16  }
   0xd   : > { %p629_p5 = por %p36_p2, %p35_p0  ;;  %p633_p6 = por %p42_p4, %p41_p3 }
   0xe   : > { %p91_p7 = scmp.eq.s32.totalorder %s611_s13, 2  ;;  %p97_p8 = scmp.eq.s32.totalorder %s366_s14, 2 }
   0xf   : > { %p401_p9 = scmp.lt.s32.totalorder %s573_s12, 3  ;;  %s648_s23 = sand.u32 1, %s569_s11  }
  0x10   : > { %p639_p10 = por %p91_p7, %p35_p0  ;;  %p643_p11 = por %p97_p8, %p41_p3 }
  0x11   : > { %s370_s24 = sshll.u32 %s573_s12, 3  ;;  %s369_s25 = sshll.u32 %s648_s23, 3 }
  0x12   : > { %s125_s28 = scalar_lea.hbm %s757_s0, %s370_s24  ;;  %s121_s30 = scalar_lea.vmem [#allocation2], %s369_s25 }
  0x13   : > { %s127_s29 = sshll.u32 %s125_s28, 4  ;;  %s129_s3 = sshll.u32 %s121_s30, 4  ;;  %s128_s29 = int_to_ptr.hbm [resolvable:$true] %s127_s29  ;;  %s130_s3 = int_to_ptr.vmem [resolvable:$true] %s129_s3 }
  0x14   : > { %p657_p12 = pnand %p401_p9, %p629_p5  ;;  %p373_p13 = scmp.ge.s32.totalorder %s573_s12, 1 }
  0x15   : > { %p153_p0 = scmp.lt.s32.totalorder %s573_s12, 4  ;;  %s118_s5 = scalar_lea.sflag [#allocation3], %s648_s23 }
  0x16   : > { %s443_s6 = sshra.s32 %s128_s29, 4  ;;  %p447_p2 = pneg %p657_p12  ;;  %s444_s6 = int_to_ptr.hbm [resolvable:$true] %s443_s6 }
  0x17   : > { %s445_s7 = scalar_lea.hbm %s444_s6, 8  ;;  %s450_s16 = scalar_lea.hbm %s757_s0, 24 }
  0x18   : > { %p446_p1 = scmp.ne.s32.totalorder %s444_s6, %s445_s7  ;;  %p451_p5 = scmp.lt.s32.totalorder %s444_s6, %s757_s0 }
  0x19   : > { %p452_p7 = scmp.lt.s32.totalorder %s450_s16, %s445_s7 }
  0x1a   : > { %p448_p3 = pnand %p447_p2, %p446_p1 }
  0x1b   : > { %p453_p8 = por %p452_p7, %p451_p5 }
  0x1c   : > { %p449_p4 = pneg %p448_p3 }
  0x1e   : > { %p454_p9 = pnand %p453_p8, %p449_p4 }
  0x20   : > { %457 = shalt.err (!%p454_p9)
}
  0x21   : > { %393 = dma.hbm_to_vmem [thread:$0]  (!%p657_p12), %s128_s29, 128, %s130_s3, %s118_s5  }
  0x22   : > { %p681_p1 = pnand %p373_p13, %p153_p0  ;;  %s144_s30 = scalar_lea.hbm %s758_s1, %s370_s24 }
  0x23   : > { %s146_s6 = sshll.u32 %s144_s30, 4  ;;  %s140_s7 = scalar_lea.vmem [#allocation5], %s369_s25  ;;  %s147_s6 = int_to_ptr.hbm [resolvable:$true] %s146_s6 }
  0x24   : > { %s148_s8 = sshll.u32 %s140_s7, 4  ;;  %s137_s14 = scalar_lea.sflag [#allocation6], %s648_s23  ;;  %s149_s8 = int_to_ptr.vmem [resolvable:$true] %s148_s8 }
  0x25   : > { %s473_s16 = sshra.s32 %s147_s6, 4  ;;  %s480_s5 = scalar_lea.hbm %s758_s1, 24  ;;  %s474_s16 = int_to_ptr.hbm [resolvable:$true] %s473_s16 }
  0x26   : > { %s475_s17 = scalar_lea.hbm %s474_s16, 8  ;;  %p481_p4 = scmp.lt.s32.totalorder %s474_s16, %s758_s1 }
  0x27   : > { %p476_p3 = scmp.ne.s32.totalorder %s474_s16, %s475_s17  ;;  %p482_p5 = scmp.lt.s32.totalorder %s480_s5, %s475_s17 }
  0x29   : > { %p478_p13 = pnand %p476_p3, %p447_p2  ;;  %p483_p7 = por %p482_p5, %p481_p4 }
  0x2b   : > { %p479_p0 = pneg %p478_p13 }
  0x2d   : > { %p484_p8 = pnand %p483_p7, %p479_p0 }
  0x2f   : > { %487 = shalt.err (!%p484_p8)
}
  0x30   : > { %396 = dma.hbm_to_vmem [thread:$0]  (!%p657_p12), %s147_s6, 128, %s149_s8, %s137_s14  }
  0x31   : > { %157 = sbr.rel (%p681_p1) target bundleno = 506 (0x1fa), region = 28  ;;  %s703_s23 = sand.u32 (!%p681_p1), 1, %s565_s10  }
  0x32   : > { %s706_s25 = sshll.u32 (!%p681_p1), %s703_s23, 3  ;;  %s160_s27 = scalar_lea.sflag (!%p681_p1), [#allocation3], %s703_s23 }
  0x33   : > { %s163_s28 = scalar_lea.vmem (!%p681_p1), [#allocation2], %s706_s25 }
  0x36   : > { %548 = dma.done.wait (%p633_p6), %s160_s27, 128  }
  0x37   : > { %550 = vsyncadd (%p633_p6), %s160_s27, 4294967168  ;;  %s170_s4 = scalar_lea.sflag [#allocation6], %s703_s23  ;;  %s173_s26 = scalar_lea.vmem [#allocation5], %s706_s25 }
  0x38   : > { %552 = dma.done.wait (%p633_p6), %s170_s4, 128  }
  0x39   : > { %554 = vsyncadd (%p633_p6), %s170_s4, 4294967168  ;;  %v201_v0 = vld [vmem:[%s173_s26] sm:$0xff]  ;;  %v200_v1 = vld [vmem:[%s163_s28] sm:$0xff]  ;;  %v238_v13 = vlaneseq  ;;  %s377_s20 = sshll.u32 %s611_s13, 3  ;;  %vm244_vm5 = vcmask 7168   ;;  %s199_s8 = scalar_lea.vmem [#allocation7], %s706_s25 }
  0x3a   : > { %211 = vmax.xlane.f32.xlu0 %v201_v0  ;;  %v240_v21 = vstv %s377_s20  ;;  %s268_s7 = scalar_lea.hbm %s759_s2, %s377_s20  ;;  %s270_s14 = sshll.u32 %s199_s8, 4  ;;  %s271_s14 = int_to_ptr.vmem [resolvable:$true] %s270_s14 }
  0x3b   : > { %v239_v18 = vshrl.u32 %v238_v13, 7  ;;  %s272_s16 = sshll.u32 %s268_s7, 4  ;;  %s258_s29 = scalar_lea.sflag [#allocation4], %s703_s23  ;;  %s273_s16 = int_to_ptr.hbm [resolvable:$true] %s272_s16 }
  0x3c   : > { %s517_s3 = sshra.s32 %s273_s16, 4  ;;  %s523_s24 = scalar_lea.hbm %s759_s2, 24  ;;  %s518_s3 = int_to_ptr.hbm [resolvable:$true] %s517_s3 }
  0x3d   : > { %v241_v25 = vadd.s32 %v240_v21, %v239_v18  ;;  %s519_s5 = scalar_lea.hbm %s518_s3, 8  ;;  %p524_p9 = scmp.lt.s32.totalorder %s518_s3, %s759_s2 }
  0x3e   : > { %p520_p6 = scmp.ne.s32.totalorder %s518_s3, %s519_s5  ;;  %p525_p1 = scmp.lt.s32.totalorder %s523_s24, %s519_s5 }
  0x3f   : > { %vm242_vm4 = vcmp.lt.s32.totalorder %v241_v25, 24 }
  0x40   : > { %p521_p12 = pnand %p520_p6, %p639_p10  ;;  %p526_p3 = por %p525_p1, %p524_p9 }
  0x42   : > { %202 = vmax.xlane.f32.xlu0 %v200_v1  ;;  %p522_p2 = pneg %p521_p12 }
  0x44   : > { %p527_p13 = pnand %p526_p3, %p522_p2 }
  0xad   : > { %v212_v2 = vpop.xlane.xlu0 %211 }
  0xae   : > { %v213_v3 = vsub.f32 %v201_v0, %v212_v2 }
  0xb0   : > { %v214_v4 = vmul.f32 1.442695, %v213_v3 }
  0xb2   : > { %435 = vpow2.f32 %v214_v4 }
  0xb5   : > { %v203_v5 = vpop.xlane.xlu0 %202 }
  0xb6   : > { %v204_v6 = vsub.f32 %v200_v1, %v203_v5 }
  0xb8   : > { %v436_v7 = vpop.eup %435  ;;  %v205_v8 = vmul.f32 1.442695, %v204_v6 }
  0xb9   : > { %216 = vadd.xlane.f32.xlu1 %v436_v7  ;;  %v218_v9 = vmul.f32 %v436_v7, %v204_v6 }
  0xba   : > { %437 = vpow2.f32 %v205_v8 }
  0xbb   : > { %219 = vadd.xlane.f32.xlu2 %v218_v9 }
  0xc0   : > { %v438_v10 = vpop.eup %437 }
  0xc1   : > { %207 = vadd.xlane.f32.xlu1 %v438_v10 }
 0x12c   : > { %v217_v11 = vpop.xlane.xlu1 %216 }
 0x12d   : > { %439 = vrcp.f32 %v217_v11  ;;  %v232_v17 = vand.u32 2147483648, %v217_v11  ;;  %v230_v20 = vand.u32 2147483647, %v217_v11  ;;  %vm226_vm1 = vweird.f32 %v217_v11 }
 0x12e   : > { %v220_v29 = vpop.xlane.xlu2 %219 }
 0x12f   : > { %v233_v24 = vor.u32 1.1754944e-38, %v232_v17  ;;  %vm231_vm3 = vcmp.eq.f32.partialorder %v230_v20, 8.507059e+37 }
 0x133   : > { %v440_v12 = vpop.eup %439 }
 0x134   : > { %v222_v14 = vmul.f32 %v440_v12, %v217_v11  ;;  %v208_v15 = vpop.xlane.xlu1 %207  ;;  %vm227_vm0 = vweird.f32 %v440_v12 }
 0x135   : > { %441 = vlog2.f32 %v208_v15  ;;  %vm228_vm2 = vmor %vm226_vm1, %vm227_vm0 }
 0x136   : > { %v223_v16 = vsub.f32 1.0, %v222_v14 }
 0x138   : > { %v224_v19 = vmul.f32 %v440_v12, %v223_v16 }
 0x13a   : > { %v225_v22 = vadd.f32 %v440_v12, %v224_v19 }
 0x13b   : > { %v442_v23 = vpop.eup %441 }
 0x13c   : > { %v229_v26 = vsel %vm228_vm2, %v440_v12, %v225_v22  ;;  %v210_v27 = vmul.f32 0.6931472, %v442_v23 }
 0x13d   : > { %v234_v28 = vsel %vm231_vm3, %v233_v24, %v229_v26 }
 0x13e   : > { %v235_v30 = vmul.f32 %v234_v28, %v220_v29 }
 0x140   : > { %v236_v31 = vsub.f32 %v210_v27, %v235_v30 }
 0x142   : > { %v243_v32 = vsel %vm242_vm4, %v236_v31, 0.0 }
 0x143   : > { %v245_v33 = vsel %vm244_vm5, %v243_v32, 0.0 }
 0x144   : > { %246 = vadd.xlane.f32.xlu2 %v245_v33 }
 0x1b7   : > { %v247_v34 = vpop.xlane.xlu2 %246 }
 0x1b8   : > { %v248_v35 = vrot.slane %v247_v34, 4 }
 0x1ba   : > { %v249_v36 = vadd.f32 %v248_v35, %v247_v34 }
 0x1bc   : > { %v250_v37 = vrot.slane %v249_v36, 2 }
 0x1be   : > { %v251_v38 = vadd.f32 %v250_v37, %v249_v36 }
 0x1c0   : > { %v252_v39 = vrot.slane %v251_v38, 1 }
 0x1c2   : > { %v253_v40 = vadd.f32 %v252_v39, %v251_v38 }
 0x1c4   : > { %382 = vpush %v253_v40 }
 0x1f5   : > { %s383_s17 = spop %382 }
 0x1f6   : > { %v255_v41 = vstv %s383_s17 }
 0x1f7   : > { %256 = vst [vmem:[%s199_s8] sm:$0xff] %v255_v41 }
 0x1f8   : > { %530 = shalt.err (!%p527_p13)
}
 0x1f9   : > { %388 = dma.vmem_to_hbm [thread:$0]  (%p639_p10), %s271_s14, 128, %s273_s16, %s258_s29  }
 0x1fa PF: > { %p402_p0 = scmp.ge.s32.totalorder %s573_s12, 2  ;;  %s284_s23 = sand.u32 1, %s561_s9  }
 0x1fb   : > { %s285_s28 = scalar_lea.sflag [#allocation4], %s284_s23 }
 0x1fc   : > { %p398_p4 = pnand %p402_p0, %p643_p11 }
 0x1fe   : > { %p399_p5 = pneg %p398_p4 }
 0x200   : > { %556 = dma.done.wait (%p399_p5), %s285_s28, 128  }
 0x201   : > { %558 = vsyncadd (%p399_p5), %s285_s28, 4294967168  ;;  %p18_p7 = scmp.ge.s32.totalorder %s615_s15, 5   ;;  %s766_s9 = smov %s565_s10 }
 0x202   : > { %s767_s10 = smov %s569_s11  ;;  %s768_s11 = smov %s627_s18 }
 0x203   : > { %s769_s12 = smov %s615_s15  ;;  %20 = sbr.rel (!%p18_p7) target bundleno = 7 (0x7), region = 86 }
 0x208   :  { %291 = vsyncpa [#allocation3], 1 }
 0x209   :  { %293 = vsyncpa [#allocation3 + $0x1], 1 }
 0x20a   :  { %294 = vsyncpa [#allocation6], 1 }
 0x20b   :  { %296 = vsyncpa [#allocation6 + $0x1], 1 }
 0x20c   :  { %297 = vsyncpa [#allocation4], 1 }
 0x20d   :  { %299 = vsyncpa [#allocation4 + $0x1], 1 }

</bundles_post_ra>
